<compile_context>
chip_gen: v7x
topology: tpu7x:2x2x1
jax: 0.10.0
libtpu: 0.0.40
codegen_flags: <defaults>
</compile_context>

<pallas_src>
import jax
import jax.numpy as jnp
from jax import lax
from jax.experimental import pallas as pl
from jax.experimental.pallas import tpu as pltpu


LANE = 128        # lane-padding quantum for feature dims
NODE_PAD = 128    # node-count padding quantum
ROW_TILE = 512    # target output-row tile (embed i, cross_sim i)
K_TILE = 512      # target source-node (contraction) tile in embed
COL_TILE = 512    # target cross_sim column tile (long unmasked vst runs)


def _round_up(x, m):
    return ((x + m - 1) // m) * m


def _pick_tile(padded, target):
    """Largest multiple of 128 that divides `padded` and is <= target."""
    t = min(target, padded)
    while padded % t:
        t -= NODE_PAD
    return t


def _vmem_limit_bytes():
    # Raise the scoped-VMEM limit above the 16/32 MiB defaults, staying within
    # physical VMEM (v5e/v6e: 128 MiB -> 96 MiB; v7x: 64 MiB -> 48 MiB).
    try:
        cap = int(getattr(pltpu.get_tpu_info(), "vmem_capacity_bytes", 0) or 0)
        if cap:
            return int(min((cap * 3) // 4, 100 * 1024 * 1024))
    except Exception:
        pass
    return 48 * 1024 * 1024


# ----------------------------- kernels --------------------------------------

def _embed_kernel(a_ref, x_ref, w_ref, b_ref, h_ref, acc_ref):
    # One (graph, row-block) of:  h = relu(A @ (X @ W) + b);  h /= ||h||_2.
    # K (source-node) axis is the innermost grid dim; acc_ref is the resident
    # f32 accumulator for the current row block.
    k = pl.program_id(2)

    @pl.when(k == 0)
    def _():
        acc_ref[...] = jnp.zeros_like(acc_ref)

    # Z block computed on the fly (fused feat-proj); bf16 MXU operands,
    # f32 accumulation.
    z = jnp.dot(x_ref[...], w_ref[...],
                preferred_element_type=jnp.float32).astype(jnp.bfloat16)
    acc_ref[...] += jnp.dot(a_ref[...], z, preferred_element_type=jnp.float32)

    @pl.when(k == pl.num_programs(2) - 1)
    def _():
        h = jnp.maximum(acc_ref[...] + b_ref[...], 0.0)
        ssq = jnp.sum(h * h, axis=-1, keepdims=True)
        # rsqrt goes to the EUP slot; matches torch h / h.norm() (no epsilon:
        # an all-zero real row yields NaN, same as the reference).
        h_ref[...] = (h * lax.rsqrt(ssq)).astype(h_ref.dtype)


def _cross_sim_kernel(hs_ref, ht_ref, o_ref):
    # cross = h_s @ h_t^T without materializing the transpose:
    # contract the last dim of both operands on the MXU.
    o_ref[...] = lax.dot_general(
        hs_ref[...], ht_ref[...],
        dimension_numbers=(((1,), (1,)), ((), ())),
        preferred_element_type=jnp.float32)


# --------------------------- pallas_call wrappers ----------------------------

def _embed(a, x, w, b, *, ti, tk):
    g, n_p, _ = a.shape
    d_p = x.shape[-1]
    dh_p = w.shape[-1]
    n_i = n_p // ti
    n_k = n_p // tk
    cost = pl.CostEstimate(
        flops=int(2 * g * n_p * n_p * dh_p + 2 * g * n_i * n_p * d_p * dh_p),
        transcendentals=int(g * n_p),
        bytes_accessed=int(2 * g * n_p * n_p          # A (bf16)
                           + 2 * g * n_i * n_p * d_p  # X re-streamed per row blk
                           + 2 * d_p * dh_p + 4 * dh_p
                           + 2 * g * n_p * dh_p))     # H out (bf16)
    return pl.pallas_call(
        _embed_kernel,
        out_shape=jax.ShapeDtypeStruct((g, n_p, dh_p), jnp.bfloat16),
        grid=(g, n_i, n_k),
        in_specs=[
            pl.BlockSpec((pl.Squeezed(), ti, tk), lambda gi, i, k: (gi, i, k)),
            pl.BlockSpec((pl.Squeezed(), tk, d_p), lambda gi, i, k: (gi, k, 0)),
            # constant-index operands: single-buffer (no double-buffer VMEM)
            pl.BlockSpec((d_p, dh_p), lambda gi, i, k: (0, 0),
                         pipeline_mode=pl.Buffered(1)),
            pl.BlockSpec((1, dh_p), lambda gi, i, k: (0, 0),
                         pipeline_mode=pl.Buffered(1)),
        ],
        out_specs=pl.BlockSpec((pl.Squeezed(), ti, dh_p),
                               lambda gi, i, k: (gi, i, 0)),
        scratch_shapes=[pltpu.VMEM((ti, dh_p), jnp.float32)],
        compiler_params=pltpu.CompilerParams(
            dimension_semantics=("parallel", "parallel", "arbitrary"),
            vmem_limit_bytes=_vmem_limit_bytes()),
        cost_estimate=cost,
    )(a, x, w, b)


def _cross_sim(h, *, ti, tj):
    _, n_p, dh_p = h.shape
    cost = pl.CostEstimate(
        flops=int(2 * n_p * n_p * dh_p),
        transcendentals=0,
        bytes_accessed=int(2 * n_p * dh_p
                           + 2 * n_p * dh_p * (n_p // ti)  # H_t re-streamed / i
                           + 4 * n_p * n_p))               # f32 writeback
    return pl.pallas_call(
        _cross_sim_kernel,
        out_shape=jax.ShapeDtypeStruct((n_p, n_p), jnp.float32),
        grid=(n_p // ti, n_p // tj),
        in_specs=[
            pl.BlockSpec((pl.Squeezed(), ti, dh_p), lambda i, j: (0, i, 0)),
            pl.BlockSpec((pl.Squeezed(), tj, dh_p), lambda i, j: (1, j, 0)),
        ],
        out_specs=pl.BlockSpec((ti, tj), lambda i, j: (i, j)),
        compiler_params=pltpu.CompilerParams(
            dimension_semantics=("parallel", "parallel"),
            vmem_limit_bytes=_vmem_limit_bytes()),
        cost_estimate=cost,
    )(h, h)


# ------------------------------ forward --------------------------------------

def tpm_forward(x_s, edge_index_s, edge_attr_s,
                x_t, edge_index_t, edge_attr_t,
                w, b):
    """Inference path of TPM.forward (train=False). Returns cross_sim [1, Ns, Nt]."""
    n_s, d_in = x_s.shape
    n_t = x_t.shape[0]
    d_hid = w.shape[-1]

    # Common padded node count so both graphs share one batched embed launch
    # (leading "parallel" axis -> both v7x TensorCores, single pipeline warmup).
    # TODO(synk): for very unequal graph sizes, split into per-graph calls to
    # avoid padding the smaller adjacency up to the larger one.
    n_p = _round_up(max(n_s, n_t), NODE_PAD)
    d_p = _round_up(d_in, LANE)
    dh_p = _round_up(d_hid, LANE)

    ti_e = _pick_tile(n_p, ROW_TILE)
    tk_e = _pick_tile(n_p, K_TILE)
    ti_c = _pick_tile(n_p, ROW_TILE)
    tj_c = _pick_tile(n_p, COL_TILE)

    # Glue: densify edge lists directly into bf16 (single ~2 B/elem pass).
    # A[dst, src] += w matches the reference GraphConv aggregation direction.
    def dense_adj(ei, ea):
        return jnp.zeros((n_p, n_p), jnp.bfloat16).at[ei[1], ei[0]].add(
            ea.astype(jnp.bfloat16))

    a = jnp.stack([dense_adj(edge_index_s, edge_attr_s),
                   dense_adj(edge_index_t, edge_attr_t)])

    def pad_x(x, n):
        return jnp.pad(x.astype(jnp.float32),
                       ((0, n_p - n), (0, d_p - d_in))).astype(jnp.bfloat16)

    x = jnp.stack([pad_x(x_s, n_s), pad_x(x_t, n_t)])
    w_p = jnp.pad(w.astype(jnp.float32),
                  ((0, d_p - d_in), (0, dh_p - d_hid))).astype(jnp.bfloat16)
    b_p = jnp.pad(b.astype(jnp.float32).reshape(1, d_hid),
                  ((0, 0), (0, dh_p - d_hid)))

    # f_update (GraphConv), fused + K-tiled:  h = relu(A @ (X @ W) + b), L2-norm.
    h = _embed(a, x, w_p, b_p, ti=ti_e, tk=tk_e)      # (2, n_p, dh_p) bf16

    cross = _cross_sim(h, ti=ti_c, tj=tj_c)           # (n_p, n_p) f32

    # TODO(synk): train=True branch (PermutationLoss + within-graph similarity
    # losses) is not implemented; inference returns only cross_sim, as in torch
    # (within_sim_1/2 are unused on the train=False path and therefore skipped).

    # slice away node padding; unsqueeze(0) as in the torch module.
    return cross[:n_s, :n_t][None]


# ------------------------------- demo ----------------------------------------

if __name__ == "__main__":
    key = jax.random.PRNGKey(0)
    k_xs, k_xt, k_es, k_et, k_ws, k_wt, k_w, k_b = jax.random.split(key, 8)

    N_S, N_T = 16, 16          # nodes per graph
    D_IN, D_HID = 32, 32       # feature / hidden dims
    E_S, E_T = 48, 48          # number of edges

    x_s = jax.random.normal(k_xs, (N_S, D_IN), jnp.float32)
    x_t = jax.random.normal(k_xt, (N_T, D_IN), jnp.float32)

    edge_index_s = jax.random.randint(k_es, (2, E_S), 0, N_S, jnp.int32)
    edge_index_t = jax.random.randint(k_et, (2, E_T), 0, N_T, jnp.int32)
    edge_attr_s = jax.random.uniform(k_ws, (E_S,), jnp.float32, 0.1, 1.0)
    edge_attr_t = jax.random.uniform(k_wt, (E_T,), jnp.float32, 0.1, 1.0)

    # deterministic f_update parameters (GraphConv weight + bias)
    w = jax.random.normal(k_w, (D_IN, D_HID), jnp.float32) * (1.0 / jnp.sqrt(D_IN))
    b = jax.random.normal(k_b, (1, D_HID), jnp.float32) * 0.1

    cross_sim = tpm_forward(x_s, edge_index_s, edge_attr_s,
                            x_t, edge_index_t, edge_attr_t,
                            w, b)
    jax.block_until_ready(cross_sim)
    assert cross_sim.shape == (1, N_S, N_T)

    # pure-JAX f32 reference (loose tolerance: kernels use bf16 MXU operands)
    def ref_embed(x, ei, ea, n):
        a = jnp.zeros((n, n), jnp.float32).at[ei[1], ei[0]].add(ea)
        h = jnp.maximum(a @ x @ w + b, 0.0)
        return h / jnp.linalg.norm(h, axis=-1, keepdims=True)

    ref = (ref_embed(x_s, edge_index_s, edge_attr_s, N_S)
           @ ref_embed(x_t, edge_index_t, edge_attr_t, N_T).T)[None]
    assert jnp.allclose(cross_sim, ref, atol=8e-2), \
        float(jnp.max(jnp.abs(cross_sim - ref)))

    print("KERNEL_OK")
</pallas_src>

<mosaic_0001>
module attributes {stable_mosaic.version = 11 : i64} {
  func.func @_embed_kernel(%arg0: i32, %arg1: i32, %arg2: i32, %arg3: memref<1x128x128xbf16, #tpu.memory_space<vmem>>, %arg4: memref<1x128x128xbf16, #tpu.memory_space<vmem>>, %arg5: memref<128x128xbf16, #tpu.memory_space<vmem>>, %arg6: memref<1x128xf32, #tpu.memory_space<vmem>>, %arg7: memref<1x128x128xbf16, #tpu.memory_space<vmem>>, %arg8: memref<128x128xf32, #tpu.memory_space<vmem>>) attributes {dimension_semantics = [#tpu.dimension_semantics<parallel>, #tpu.dimension_semantics<parallel>, #tpu.dimension_semantics<arbitrary>], iteration_bounds = array<i64: 2, 1, 1>, scalar_prefetch = 0 : i64, scratch_operands = 1 : i64, tpu.core_type = #tpu.core_type<tc>, window_params = [{transform_indices = @transform_0, window_bounds = array<i64: 1, 128, 128>}, {transform_indices = @transform_1, window_bounds = array<i64: 1, 128, 128>}, {pipeline_mode = #tpu.pipeline_mode<synchronous>, transform_indices = @transform_2, window_bounds = array<i64: 128, 128>}, {pipeline_mode = #tpu.pipeline_mode<synchronous>, transform_indices = @transform_3, window_bounds = array<i64: 1, 128>}, {transform_indices = @transform_4, window_bounds = array<i64: 1, 128, 128>}]} {
    %c0_i32 = arith.constant 0 : i32
    %0 = arith.cmpi eq, %arg2, %c0_i32 : i32
    %1 = arith.extui %0 : i1 to i32
    %c0_i32_0 = arith.constant 0 : i32
    %2 = arith.cmpi ne, %1, %c0_i32_0 : i32
    scf.if %2 {
      %cst_15 = arith.constant 0.000000e+00 : f32
      %17 = vector.broadcast %cst_15 : f32 to vector<128x128xf32>
      %c0_16 = arith.constant 0 : index
      %c0_17 = arith.constant 0 : index
      %18 = vector.load %arg8[%c0_16, %c0_17] : memref<128x128xf32, #tpu.memory_space<vmem>>, vector<128x128xf32>
      tpu.vector_store %arg8[%c0_16, %c0_17], %17 {strides = array<i32>} : memref<128x128xf32, #tpu.memory_space<vmem>>, vector<128x128xf32>,
    } else {
    }
    %c0 = arith.constant 0 : index
    %c0_1 = arith.constant 0 : index
    %c0_2 = arith.constant 0 : index
    %3 = vector.load %arg4[%c0, %c0_1, %c0_2] : memref<1x128x128xbf16, #tpu.memory_space<vmem>>, vector<1x128x128xbf16>
    %4 = vector.shape_cast %3 : vector<1x128x128xbf16> to vector<128x128xbf16>
    %c0_3 = arith.constant 0 : index
    %c0_4 = arith.constant 0 : index
    %5 = vector.load %arg5[%c0_3, %c0_4] : memref<128x128xbf16, #tpu.memory_space<vmem>>, vector<128x128xbf16>
    %cst = arith.constant dense<0.000000e+00> : vector<128x128xf32>
    %6 = tpu.matmul %4, %5, %cst {dimension_numbers = #tpu.dot_dimension_numbers<[1], [0], [0], [1], [0, 0, 1, 1], [], []>} : vector<128x128xbf16>, vector<128x128xbf16>, vector<128x128xf32> -> vector<128x128xf32>
    %7 = arith.truncf %6 : vector<128x128xf32> to vector<128x128xbf16>
    %c0_5 = arith.constant 0 : index
    %c0_6 = arith.constant 0 : index
    %8 = vector.load %arg8[%c0_5, %c0_6] : memref<128x128xf32, #tpu.memory_space<vmem>>, vector<128x128xf32>
    %c0_7 = arith.constant 0 : index
    %c0_8 = arith.constant 0 : index
    %c0_9 = arith.constant 0 : index
    %9 = vector.load %arg3[%c0_7, %c0_8, %c0_9] : memref<1x128x128xbf16, #tpu.memory_space<vmem>>, vector<1x128x128xbf16>
    %10 = vector.shape_cast %9 : vector<1x128x128xbf16> to vector<128x128xbf16>
    %cst_10 = arith.constant dense<0.000000e+00> : vector<128x128xf32>
    %11 = tpu.matmul %10, %7, %cst_10 {dimension_numbers = #tpu.dot_dimension_numbers<[1], [0], [0], [1], [0, 0, 1, 1], [], []>} : vector<128x128xbf16>, vector<128x128xbf16>, vector<128x128xf32> -> vector<128x128xf32>
    %12 = arith.addf %8, %11 : vector<128x128xf32>
    %c0_11 = arith.constant 0 : index
    %c0_12 = arith.constant 0 : index
    %13 = vector.load %arg8[%c0_11, %c0_12] : memref<128x128xf32, #tpu.memory_space<vmem>>, vector<128x128xf32>
    tpu.vector_store %arg8[%c0_11, %c0_12], %12 {strides = array<i32>} : memref<128x128xf32, #tpu.memory_space<vmem>>, vector<128x128xf32>,
    %c0_i32_13 = arith.constant 0 : i32
    %14 = arith.cmpi eq, %arg2, %c0_i32_13 : i32
    %15 = arith.extui %14 : i1 to i32
    %c0_i32_14 = arith.constant 0 : i32
    %16 = arith.cmpi ne, %15, %c0_i32_14 : i32
    scf.if %16 {
      %c0_15 = arith.constant 0 : index
      %c0_16 = arith.constant 0 : index
      %17 = vector.load %arg8[%c0_15, %c0_16] : memref<128x128xf32, #tpu.memory_space<vmem>>, vector<128x128xf32>
      %c0_17 = arith.constant 0 : index
      %c0_18 = arith.constant 0 : index
      %18 = vector.load %arg6[%c0_17, %c0_18] : memref<1x128xf32, #tpu.memory_space<vmem>>, vector<1x128xf32>
      %19 = vector.broadcast %18 : vector<1x128xf32> to vector<128x128xf32>
      %20 = arith.addf %17, %19 : vector<128x128xf32>
      %cst_19 = arith.constant 0.000000e+00 : f32
      %21 = vector.broadcast %cst_19 : f32 to vector<128x128xf32>
      %22 = arith.maximumf %20, %21 : vector<128x128xf32>
      %23 = arith.mulf %22, %22 : vector<128x128xf32>
      %cst_20 = arith.constant dense<0.000000e+00> : vector<128xf32>
      %24 = vector.multi_reduction <add>, %23, %cst_20 [1] : vector<128x128xf32> to vector<128xf32>
      %25 = vector.shape_cast %24 : vector<128xf32> to vector<128x1xf32>
      %26 = math.rsqrt %25 : vector<128x1xf32>
      %27 = vector.broadcast %26 : vector<128x1xf32> to vector<128x128xf32>
      %28 = arith.mulf %22, %27 : vector<128x128xf32>
      %29 = arith.truncf %28 : vector<128x128xf32> to vector<128x128xbf16>
      %c0_21 = arith.constant 0 : index
      %c0_22 = arith.constant 0 : index
      %c0_23 = arith.constant 0 : index
      %30 = vector.load %arg7[%c0_21, %c0_22, %c0_23] : memref<1x128x128xbf16, #tpu.memory_space<vmem>>, vector<1x128x128xbf16>
      %31 = vector.shape_cast %30 : vector<1x128x128xbf16> to vector<128x128xbf16>
      %32 = vector.shape_cast %29 : vector<128x128xbf16> to vector<1x128x128xbf16>
      tpu.vector_store %arg7[%c0_21, %c0_22, %c0_23], %32 {strides = array<i32>} : memref<1x128x128xbf16, #tpu.memory_space<vmem>>, vector<1x128x128xbf16>,
    } else {
    }
    return
  }
  func.func @transform_0(%arg0: i32, %arg1: i32, %arg2: i32) -> (i32, i32, i32) {
    %c0_i32 = arith.constant 0 : i32
    return %arg0, %arg1, %arg2 : i32, i32, i32
  }
  func.func @transform_1(%arg0: i32, %arg1: i32, %arg2: i32) -> (i32, i32, i32) {
    %c0_i32 = arith.constant 0 : i32
    %c0_i32_0 = arith.constant 0 : i32
    return %arg0, %arg2, %c0_i32 : i32, i32, i32
  }
  func.func @transform_2(%arg0: i32, %arg1: i32, %arg2: i32) -> (i32, i32) {
    %c0_i32 = arith.constant 0 : i32
    %c0_i32_0 = arith.constant 0 : i32
    %c0_i32_1 = arith.constant 0 : i32
    return %c0_i32, %c0_i32_0 : i32, i32
  }
  func.func @transform_3(%arg0: i32, %arg1: i32, %arg2: i32) -> (i32, i32) {
    %c0_i32 = arith.constant 0 : i32
    %c0_i32_0 = arith.constant 0 : i32
    %c0_i32_1 = arith.constant 0 : i32
    return %c0_i32, %c0_i32_0 : i32, i32
  }
  func.func @transform_4(%arg0: i32, %arg1: i32, %arg2: i32) -> (i32, i32, i32) {
    %c0_i32 = arith.constant 0 : i32
    %c0_i32_0 = arith.constant 0 : i32
    return %arg0, %arg1, %c0_i32 : i32, i32, i32
  }
}

</mosaic_0001>

<bundles_post_ra>
// kernel: tpu_custom_call.1
= control target key start
LH: loop header
LB: loop body
LE: loop exit
PB: predicated region body
PF: predicated region fallthrough
CT: control target
= control target key end

     0   :  { %s2106_s0 = inlined_call_operand.hbm [shape: bf16[2,128,128], index: 0, kind: input, shape index: {}]   ;;  %s2107_s1 = inlined_call_operand.hbm [shape: bf16[2,128,128], index: 1, kind: input, shape index: {}]   ;;  %s2108_s2 = inlined_call_operand.hbm [shape: bf16[128,128], index: 2, kind: input, shape index: {}]   ;;  %s2109_s3 = inlined_call_operand.vmem [shape: f32[1,128], index: 3, kind: input, shape index: {}]   ;;  %s2110_s4 = inlined_call_operand.hbm [shape: bf16[2,128,128], index: 4, kind: output, shape index: {}]  }
   0x1   :  { %2119 = sst [smem:[#allocation15_spill]] %s2106_s0 }
   0x2   :  { %2120 = sst [smem:[#allocation16_spill]] %s2108_s2 }
   0x3   :  { %9 = vsyncpa [#allocation4], 0 }
   0x4   :  { %11 = vsyncpa [#allocation4 + $0x1], 0 }
   0x5   :  { %12 = vsyncpa [#allocation7], 0 }
   0x6   :  { %14 = vsyncpa [#allocation7 + $0x1], 0 }
   0x7   :  { %15 = vsyncpa [#allocation5], 0 }
   0x8   :  { %17 = vsyncpa [#allocation5 + $0x1], 0  ;;  %s1703_s15 = smov 0   ;;  %s1705_s16 = smov 0  }
   0x9   :  { %s1707_s17 = smov 0   ;;  %s1709_s18 = smov 0  }
   0xa   :  { %s1711_s19 = smov 0   ;;  %s1713_s20 = smov 0  }
   0xb LB: > { %s1734_s21 = sadd.s32 4294967295, %s1668_s20   ;;  %s1129_s22 = sadd.s32 4294967294, %s1668_s20   ;;  %s1668_s20 = sphi %s1713_s20, %s23_s20   ;;  %s1664_s19 = sphi %s1711_s19, %s2145_s19   ;;  %s1660_s18 = sphi %s1709_s18, %s2144_s18   ;;  %s1656_s17 = sphi %s1707_s17, %s2143_s17   ;;  %s1652_s16 = sphi %s1705_s16, %s2142_s16   ;;  %s1648_s15 = sphi %s1703_s15, %s2141_s15  }
   0xc   : > { %p66_p0 = scmp.ne.s32.totalorder %s1652_s16, %s1648_s15  ;;  %p2111_p1 = scmp.eq.s32.totalorder %s1734_s21, 0 }
   0xd   : > { %p168_p3 = scmp.eq.s32.totalorder %s1129_s22, 1  ;;  %p1130_p5 = scmp.ge.s32.totalorder %s1668_s20, 1 }
   0xe   : > { %p1743_p4 = por %p2111_p1, %p66_p0  ;;  %p175_p7 = scmp.lt.s32.totalorder %s1668_s20, 3 }
   0xf   : > { %p1748_p6 = por %p168_p3, %p66_p0  ;;  %s1670_s26 = smov [#allocation8]  }
  0x10   : > { %s2121_s23 = scalar_select %p1743_p4, 1, 0 }
  0x11   : > { %s2122_s24 = scalar_select %p1748_p6, 1, 0 }
  0x12   : > { %p1753_p8 = pnand %p1130_p5, %p175_p7  ;;  %s187_s27 = sshll.u32 %s1670_s26, 4  ;;  %s188_s27 = int_to_ptr.vmem [resolvable:$true] %s187_s27 }
  0x13   : > { %s42_s29 = sadd.s32 1, %s1664_s19  ;;  %s2125_s2 = sld [smem:[#allocation16_spill]] }
  0x14   : > { %s2123_s25 = scalar_select %p1753_p8, 1, 0 }
  0x15   : > { %p1362_p9 = pneg %p1753_p8 }
  0x17   : > { %p1762_p11 = pnand %p1362_p9, %p2111_p1 }
  0x19   : > { %s1490_s6 = scalar_lea.hbm %s2125_s2, 1024  ;;  %p1492_p13 = pneg %p1762_p11 }
  0x1a   : > { %p1491_p12 = scmp.ne.s32.totalorder %s2125_s2, %s1490_s6  ;;  %p1497_p5 = scmp.lt.u32.totalorder %s1490_s6, %s2125_s2 }
  0x1c   : > { %p1493_p0 = pnand %p1492_p13, %p1491_p12 }
  0x1e   : > { %p1494_p3 = pneg %p1493_p0 }
  0x20   : > { %p1499_p7 = pnand %p1497_p5, %p1494_p3 }
  0x22   : > { %1502 = shalt.err (!%p1499_p7)
}
  0x23   : > { %s1503_s11 = scalar_lea.vmem %s188_s27, 1024  ;;  %p1511_p2 = scmp.lt.s32.totalorder %s188_s27, %s188_s27 }
  0x24   : > { %p1504_p9 = scmp.ne.s32.totalorder %s188_s27, %s1503_s11  ;;  %p1512_p6 = scmp.lt.s32.totalorder %s1503_s11, %s1503_s11 }
  0x26   : > { %p1506_p10 = pnand %p1504_p9, %p1492_p13  ;;  %p1513_p4 = por %p1512_p6, %p1511_p2 }
  0x28   : > { %p1507_p1 = pneg %p1506_p10 }
  0x2a   : > { %p1514_p8 = pnand %p1513_p4, %p1507_p1 }
  0x2c   : > { %1517 = shalt.err (!%p1514_p8)
}
  0x2d   : > { %s2114_s12 = smov 64   ;;  %s2116_s13 = smov 4  }
  0x2e   : > { %1365 = dma.hbm_to_vmem [thread:$0]  (!%p1762_p11), %s2125_s2, 1024, %s188_s27, [#allocation7], %s2114_s12, %s2114_s12, %s2116_s13  }
  0x2f   : > { %p44_p1 = scmp.ge.s32.totalorder %s42_s29, 2  ;;  %s53_s26 = sadd.s32 1, %s1656_s17 }
  0x30   : > { %p60_p2 = scmp.ne.s32.totalorder %s1656_s17, %s1652_s16  ;;  %p61_p4 = scmp.eq.s32.totalorder %s1668_s20, 0 }
  0x31   : > { %s2147_s29 = smov (%p44_p1, %s42_s29), 0  ;;  %p2128_p8 = scmp.eq.s32.totalorder %s1734_s21, 1 }
  0x32   : > { %2126 = sst [smem:[#allocation14_spill]] %s2147_s29  ;;  %p1792_p6 = por %p61_p4, %p60_p2 }
  0x33   : > { %p1798_p10 = por %p2128_p8, %p60_p2  ;;  %s46_s5 = ssub.s32 %s1664_s19, %s2147_s29 }
  0x34   : > { %p1378_p12 = scmp.lt.s32.totalorder %s1668_s20, 2  ;;  %p51_p11 = scmp.eq.s32.totalorder %s46_s5, 0 }
  0x35   : > { %s204_s27 = sand.u32 1, %s1656_s17   ;;  %s1190_s8 = sshll.u32 %s1664_s19, 10 }
  0x36   : > { %s1133_s6 = sshll.u32 %s204_s27, 6  ;;  %s2130_s0 = sld [smem:[#allocation15_spill]] }
  0x37   : > { %s1807_s7 = scalar_select %p51_p11, %s1656_s17, %s53_s26  }
  0x38   : > { %s208_s14 = scalar_lea.vmem [#allocation3], %s1133_s6  ;;  %p1819_p13 = pnand %p1378_p12, %p1792_p6 }
  0x39   : > { %s218_s22 = sshll.u32 %s208_s14, 4  ;;  %s1826_s9 = scalar_lea.hbm %s2107_s1, %s1190_s8  ;;  %s1815_s22 = int_to_ptr.vmem [resolvable:$true] %s218_s22 }
  0x3a   : > { %s232_s10 = scalar_lea.vmem [#allocation6], %s1133_s6  ;;  %s1830_s2 = scalar_lea.sflag [#allocation4], %s204_s27 }
  0x3b   : > { %s1828_s13 = sshll.u32 %s232_s10, 4  ;;  %p1520_p3 = pneg %p1819_p13  ;;  %s1862_s13 = int_to_ptr.vmem [resolvable:$true] %s1828_s13 }
  0x3c   : > { %s1813_s11 = scalar_lea.hbm %s2130_s0, %s1190_s8  ;;  %s1523_s12 = scalar_lea.hbm %s2130_s0, 2048 }
  0x3d   : > { %s1518_s14 = scalar_lea.hbm %s1813_s11, 1024  ;;  %p1524_p9 = scmp.lt.u32.totalorder %s1813_s11, %s2130_s0 }
  0x3e   : > { %p1519_p0 = scmp.ne.s32.totalorder %s1813_s11, %s1518_s14  ;;  %p1525_p1 = scmp.lt.u32.totalorder %s1523_s12, %s1518_s14 }
  0x3f   : > { %p1527_p4 = scmp.lt.u32.totalorder %s1518_s14, %s1813_s11 }
  0x40   : > { %p1521_p5 = pnand %p1520_p3, %p1519_p0  ;;  %p1526_p2 = por %p1525_p1, %p1524_p9 }
  0x42   : > { %p1522_p7 = pneg %p1521_p5  ;;  %p1528_p6 = por %p1527_p4, %p1526_p2 }
  0x44   : > { %p1529_p8 = pnand %p1528_p6, %p1522_p7 }
  0x46   : > { %1532 = shalt.err (!%p1529_p8)
}
  0x47   : > { %s1533_s27 = scalar_lea.vmem %s1815_s22, 1024  ;;  %s1673_s29 = smov [#allocation3]  }
  0x48   : > { %p1534_p12 = scmp.ne.s32.totalorder %s1815_s22, %s1533_s27  ;;  %s1538_s6 = sshll.u32 %s1673_s29, 4  ;;  %s1539_s6 = int_to_ptr.vmem [resolvable:$false] %s1538_s6 }
  0x49   : > { %s1540_s10 = scalar_lea.vmem %s1539_s6, 2048  ;;  %p1541_p5 = scmp.lt.s32.totalorder %s1815_s22, %s1539_s6 }
  0x4a   : > { %p1536_p11 = pnand %p1534_p12, %p1520_p3  ;;  %p1542_p9 = scmp.lt.s32.totalorder %s1540_s10, %s1533_s27 }
  0x4c   : > { %p1537_p0 = pneg %p1536_p11  ;;  %p1543_p1 = por %p1542_p9, %p1541_p5 }
  0x4e   : > { %p1544_p2 = pnand %p1543_p1, %p1537_p0 }
  0x50   : > { %1547 = shalt.err (!%p1544_p2)
}
  0x51   : > { %s2132_s14 = smov 4   ;;  %s2133_s30 = smov 64  }
  0x52   : > { %1369 = dma.hbm_to_vmem [thread:$0]  (!%p1819_p13), %s1813_s11, 1024, %s1815_s22, %s1830_s2, %s2133_s30, %s2133_s30, %s2132_s14  }
  0x53   : > { %s228_s12 = sand.u32 1, %s1668_s20   ;;  %s1548_s8 = scalar_lea.hbm %s1826_s9, 1024 }
  0x54   : > { %s1865_s26 = scalar_lea.sflag [#allocation7], %s228_s12  ;;  %p1549_p7 = scmp.ne.s32.totalorder %s1826_s9, %s1548_s8 }
  0x55   : > { %s1553_s6 = scalar_lea.hbm %s2107_s1, 2048  ;;  %p1554_p8 = scmp.lt.u32.totalorder %s1826_s9, %s2107_s1 }
  0x56   : > { %p1551_p4 = pnand %p1549_p7, %p1520_p3  ;;  %p1555_p12 = scmp.lt.u32.totalorder %s1553_s6, %s1548_s8 }
  0x57   : > { %p1557_p0 = scmp.lt.u32.totalorder %s1548_s8, %s1826_s9 }
  0x58   : > { %p1552_p6 = pneg %p1551_p4  ;;  %p1556_p11 = por %p1555_p12, %p1554_p8 }
  0x5a   : > { %p1558_p5 = por %p1557_p0, %p1556_p11 }
  0x5c   : > { %p1559_p9 = pnand %p1558_p5, %p1552_p6 }
  0x5e   : > { %1562 = shalt.err (!%p1559_p9)
}
  0x5f   : > { %s1563_s2 = scalar_lea.vmem %s1862_s13, 1024  ;;  %s1674_s11 = smov [#allocation6]  }
  0x60   : > { %p1564_p1 = scmp.ne.s32.totalorder %s1862_s13, %s1563_s2  ;;  %s1568_s22 = sshll.u32 %s1674_s11, 4  ;;  %s1569_s22 = int_to_ptr.vmem [resolvable:$false] %s1568_s22 }
  0x61   : > { %s1570_s0 = scalar_lea.vmem %s1569_s22, 2048  ;;  %p1571_p4 = scmp.lt.s32.totalorder %s1862_s13, %s1569_s22 }
  0x62   : > { %p1566_p2 = pnand %p1564_p1, %p1520_p3  ;;  %p1572_p8 = scmp.lt.s32.totalorder %s1570_s0, %s1563_s2 }
  0x64   : > { %p1567_p7 = pneg %p1566_p2  ;;  %p1573_p12 = por %p1572_p8, %p1571_p4 }
  0x66   : > { %p1574_p11 = pnand %p1573_p12, %p1567_p7 }
  0x68   : > { %1577 = shalt.err (!%p1574_p11)
}
  0x69   : > { %1372 = dma.hbm_to_vmem [thread:$0]  (!%p1819_p13), %s1826_s9, 1024, %s1862_s13, %s1865_s26, %s2133_s30, %s2133_s30, %s2132_s14  }
  0x6a   : > { %p2134_p3 = scmp.ne.s32.totalorder %s2123_s25, 0 }
  0x6b   : > { %s1897_s12 = sand.u32 (!%p2134_p3), 1, %s1652_s16   ;;  %p2135_p6 = scmp.ne.s32.totalorder (!%p2134_p3), %s2121_s23, 0 }
  0x6c   : > { %253 = sbr.rel (%p2134_p3) target bundleno = 825 (0x339), region = 36  ;;  %s1900_s8 = sshll.u32 (!%p2134_p3), %s1897_s12, 6 }
  0x6d   : > { %s256_s5 = scalar_lea.sflag (!%p2134_p3), [#allocation4], %s1897_s12  ;;  %s1904_s27 = scalar_lea.vmem (!%p2134_p3), [#allocation3], %s1900_s8 }
  0x73   : > { %1631 = dma.done.wait (%p2135_p6), %s256_s5, 1024  }
  0x74   : > { %1633 = vsyncadd (%p2135_p6), %s256_s5, 4294966272  ;;  %s264_s25 = sand.u32 1, %s1734_s21   ;;  %s1912_s9 = scalar_lea.vmem [#allocation6], %s1900_s8 }
  0x75   : > { %s265_s13 = scalar_lea.sflag [#allocation7], %s264_s25 }
  0x76   : > { %1635 = dma.done.wait (%p2135_p6), %s265_s13, 1024  }
  0x77   : > { %1637 = vsyncadd (%p2135_p6), %s265_s13, 4294966272  ;;  %p2136_p13 = scmp.eq.s32.totalorder %s1734_s21, 0 }
  0x79   : > { %1639 = dma.done.wait (%p2136_p13), [#allocation7], 1024   ;;  %p2137_p0 = pmov %p2136_p13 }
  0x7a   : > { %v1434_v0 = vld [vmem:[#allocation8] sm:$0xff]   ;;  %v1435_v1 = vld [vmem:[#allocation8 + $0x8] sm:$0xff]   ;;  %v1436_v2 = vld [vmem:[#allocation8 + $0x10] sm:$0xff]   ;;  %s2028_s14 = scalar_lea.vmem [#allocation9], %s1900_s8  ;;  %s1208_s30 = sshll.u32 %s1660_s18, 10 }
  0x7b   : > { %1641 = vsyncadd (%p2137_p0), [#allocation7], 4294966272  ;;  %1288 = vmatprep.subr.bf16.mxu0 %v1434_v0  ;;  %v1437_v3 = vld [vmem:[#allocation8 + $0x18] sm:$0xff]   ;;  %v1442_v4 = vld [vmem:[%s1912_s9] sm:$0xff]   ;;  %s1002_s26 = sshll.u32 %s2028_s14, 4  ;;  %s2054_s10 = scalar_lea.hbm %s2110_s4, %s1208_s30  ;;  %s2056_s26 = int_to_ptr.vmem [resolvable:$true] %s1002_s26 }
  0x7c   : > { %1289 = vmatpush3.bf16.msra.mxu0 %v1434_v0  ;;  %1304 = vmatprep.mubr.bf16.mxu0 %v1442_v4  ;;  %v1438_v5 = vld [vmem:[#allocation8 + $0x20] sm:$0xff]   ;;  %v1439_v6 = vld [vmem:[#allocation8 + $0x28] sm:$0xff]   ;;  %v1440_v7 = vld [vmem:[#allocation8 + $0x30] sm:$0xff]   ;;  %s987_s18 = scalar_lea.sflag [#allocation5], %s1897_s12  ;;  %s1578_s2 = scalar_lea.vmem %s2056_s26, 1024 }
  0x7d   : > { %1290 = vmatprep.subr.bf16.mxu0 %v1435_v1  ;;  %v1441_v8 = vld [vmem:[#allocation8 + $0x38] sm:$0xff]   ;;  %v1443_v9 = vld [vmem:[%s1912_s9 + $0x8] sm:$0xff]   ;;  %v1444_v10 = vld [vmem:[%s1912_s9 + $0x10] sm:$0xff]   ;;  %p1579_p5 = scmp.ne.s32.totalorder %s2056_s26, %s1578_s2  ;;  %s1675_s11 = smov [#allocation9]  }
  0x7e   : > { %v1445_v11 = vld [vmem:[%s1912_s9 + $0x18] sm:$0xff]   ;;  %v1446_v12 = vld [vmem:[%s1912_s9 + $0x20] sm:$0xff]   ;;  %v1447_v13 = vld [vmem:[%s1912_s9 + $0x28] sm:$0xff]   ;;  %s1582_s22 = sshll.u32 %s1675_s11, 4  ;;  %s1583_s22 = int_to_ptr.vmem [resolvable:$false] %s1582_s22 }
  0x7f   : > { %v1448_v14 = vld [vmem:[%s1912_s9 + $0x30] sm:$0xff]   ;;  %v1449_v15 = vld [vmem:[%s1912_s9 + $0x38] sm:$0xff]   ;;  %v1450_v16 = vld [vmem:[%s1904_s27] sm:$0xff]   ;;  %p1580_p9 = pnand %p1579_p5, %p1798_p10  ;;  %s1584_s0 = scalar_lea.vmem %s1583_s22, 2048 }
  0x80   : > { %1291 = vmatpush3.bf16.msra.mxu0 %v1435_v1  ;;  %1336 = vmatprep.mubr.bf16.mxu1 %v1450_v16  ;;  %v1451_v41 = vld [vmem:[%s1904_s27 + $0x8] sm:$0xff]   ;;  %v1452_v42 = vld [vmem:[%s1904_s27 + $0x10] sm:$0xff]   ;;  %v1453_v43 = vld [vmem:[%s1904_s27 + $0x18] sm:$0xff]   ;;  %p1585_p2 = scmp.lt.s32.totalorder %s2056_s26, %s1583_s22  ;;  %p1586_p7 = scmp.lt.s32.totalorder %s1584_s0, %s1578_s2 }
  0x81   : > { %1292 = vmatprep.subr.bf16.mxu0 %v1436_v2  ;;  %v1454_v44 = vld [vmem:[%s1904_s27 + $0x20] sm:$0xff]   ;;  %v1455_v45 = vld [vmem:[%s1904_s27 + $0x28] sm:$0xff]   ;;  %v1456_v46 = vld [vmem:[%s1904_s27 + $0x30] sm:$0xff]   ;;  %p1581_p1 = pneg %p1580_p9 }
  0x82   : > { %v1457_v47 = vld [vmem:[%s1904_s27 + $0x38] sm:$0xff]   ;;  %v1941_v48 = vld [vmem:[%s2109_s3] ss:$0 sm:$0xff]  ;;  %p1587_p4 = por %p1586_p7, %p1585_p2 }
  0x84   : > { %1293 = vmatpush3.bf16.msra.mxu0 %v1436_v2  ;;  %p1588_p8 = pnand %p1587_p4, %p1581_p1 }
  0x85   : > { %1294 = vmatprep.subr.bf16.mxu0 %v1437_v3 }
  0x88   : > { %1295 = vmatpush3.bf16.msra.mxu0 %v1437_v3 }
  0x89   : > { %1296 = vmatprep.subr.bf16.mxu0 %v1438_v5 }
  0x8c   : > { %1297 = vmatpush3.bf16.msra.mxu0 %v1438_v5 }
  0x8d   : > { %1298 = vmatprep.subr.bf16.mxu0 %v1439_v6 }
  0x90   : > { %1299 = vmatpush3.bf16.msra.mxu0 %v1439_v6 }
  0x91   : > { %1300 = vmatprep.subr.bf16.mxu0 %v1440_v7 }
  0x94   : > { %1301 = vmatpush3.bf16.msra.mxu0 %v1440_v7 }
  0x95   : > { %1302 = vmatprep.subr.bf16.mxu0 %v1441_v8 }
  0x98   : > { %1303 = vmatpush3.bf16.msra.mxu0 %v1441_v8 }
  0x9b   : > { %1305 = vmatmul.mubr.bf16.vlgmr.msra.gmra.mrb[0].mxu0 %v1443_v9 }
  0x9c   : > { %1308 = vmatprep.mubr.bf16.mxu0 %v1444_v10 }
  0xa3   : > { %1309 = vmatmul.mubr.bf16.gmra.mrb[4].mxu0 %v1445_v11 }
  0xa4   : > { %1312 = vmatprep.mubr.bf16.mxu0 %v1446_v12 }
  0xab   : > { %1313 = vmatmul.mubr.bf16.gmra.mrb[8].mxu0 %v1447_v13 }
  0xac   : > { %1316 = vmatprep.mubr.bf16.mxu0 %v1448_v14 }
  0xb3   : > { %1317 = vmatmul.mubr.bf16.gmra.mrb[12].mxu0 %v1449_v15 }
 0x16e   : > { %v1306_v17 = vpop.f32.mrb[0].mxu0 }
 0x16f   : > { %v488_v18 = vpop.f32.mrb[1].mxu0 }
 0x170   : > { %v1307_v19 = vpop.f32.mrb[2].mxu0 }
 0x171   : > { %v552_v20 = vpack.c.bf16 %v1307_v19, %v1306_v17  ;;  %v491_v21 = vpop.f32.mrb[3].mxu0 }
 0x172   : > { %v551_v22 = vpack.c.bf16 %v491_v21, %v488_v18 }
 0x174   : > { %1320 = vmatprep.subr.bf16.mxu1 %v551_v22 }
 0x175   : > { %1321 = vmatpush3.bf16.msra.mxu1 %v551_v22 }
 0x176   : > { %v1310_v23 = vpop.f32.mrb[4].mxu0  ;;  %1322 = vmatprep.subr.bf16.mxu1 %v552_v20 }
 0x177   : > { %v504_v24 = vpop.f32.mrb[5].mxu0 }
 0x178   : > { %v1311_v25 = vpop.f32.mrb[6].mxu0 }
 0x179   : > { %v554_v26 = vpack.c.bf16 %v1311_v25, %v1310_v23  ;;  %v507_v27 = vpop.f32.mrb[7].mxu0  ;;  %1323 = vmatpush3.bf16.msra.mxu1 %v552_v20 }
 0x17a   : > { %v553_v28 = vpack.c.bf16 %v507_v27, %v504_v24 }
 0x17c   : > { %1324 = vmatprep.subr.bf16.mxu1 %v553_v28 }
 0x17d   : > { %1325 = vmatpush3.bf16.msra.mxu1 %v553_v28 }
 0x17e   : > { %v1314_v29 = vpop.f32.mrb[8].mxu0  ;;  %1326 = vmatprep.subr.bf16.mxu1 %v554_v26 }
 0x17f   : > { %v520_v30 = vpop.f32.mrb[9].mxu0 }
 0x180   : > { %v1315_v31 = vpop.f32.mrb[10].mxu0 }
 0x181   : > { %v556_v32 = vpack.c.bf16 %v1315_v31, %v1314_v29  ;;  %v523_v33 = vpop.f32.mrb[11].mxu0  ;;  %1327 = vmatpush3.bf16.msra.mxu1 %v554_v26 }
 0x182   : > { %v555_v34 = vpack.c.bf16 %v523_v33, %v520_v30 }
 0x184   : > { %1328 = vmatprep.subr.bf16.mxu1 %v555_v34 }
 0x185   : > { %1329 = vmatpush3.bf16.msra.mxu1 %v555_v34 }
 0x186   : > { %v1318_v35 = vpop.f32.mrb[12].mxu0  ;;  %1330 = vmatprep.subr.bf16.mxu1 %v556_v32 }
 0x187   : > { %v536_v36 = vpop.f32.mrb[13].mxu0 }
 0x188   : > { %v1319_v37 = vpop.f32.mrb[14].mxu0 }
 0x189   : > { %v558_v38 = vpack.c.bf16 %v1319_v37, %v1318_v35  ;;  %v539_v39 = vpop.f32.mrb[15].mxu0  ;;  %1331 = vmatpush3.bf16.msra.mxu1 %v556_v32 }
 0x18a   : > { %v557_v40 = vpack.c.bf16 %v539_v39, %v536_v36 }
 0x18c   : > { %1332 = vmatprep.subr.bf16.mxu1 %v557_v40 }
 0x18d   : > { %1333 = vmatpush3.bf16.msra.mxu1 %v557_v40 }
 0x18e   : > { %1334 = vmatprep.subr.bf16.mxu1 %v558_v38 }
 0x191   : > { %1335 = vmatpush3.bf16.msra.mxu1 %v558_v38 }
 0x194   : > { %1337 = vmatmul.mubr.bf16.vlgmr.msra.gmra.mrb[0].mxu1 %v1451_v41 }
 0x195   : > { %1340 = vmatprep.mubr.bf16.mxu1 %v1452_v42 }
 0x19c   : > { %1341 = vmatmul.mubr.bf16.gmra.mrb[4].mxu1 %v1453_v43 }
 0x19d   : > { %1344 = vmatprep.mubr.bf16.mxu1 %v1454_v44 }
 0x1a4   : > { %1345 = vmatmul.mubr.bf16.gmra.mrb[8].mxu1 %v1455_v45 }
 0x1a5   : > { %1348 = vmatprep.mubr.bf16.mxu1 %v1456_v46 }
 0x1ac   : > { %1349 = vmatmul.mubr.bf16.gmra.mrb[12].mxu1 %v1457_v47 }
 0x267   : > { %v1338_v49 = vpop.f32.mrb[0].mxu1 }
 0x268   : > { %v796_v50 = vadd.f32 %v1338_v49, %v1941_v48  ;;  %v673_v51 = vpop.f32.mrb[1].mxu1 }
 0x269   : > { %v794_v52 = vadd.f32 %v1941_v48, %v673_v51  ;;  %v1339_v53 = vpop.f32.mrb[2].mxu1 }
 0x26a   : > { %v1945_v54 = vmax.f32 %v796_v50, 0.0  ;;  %v797_v55 = vadd.f32 %v1339_v53, %v1941_v48  ;;  %v676_v56 = vpop.f32.mrb[3].mxu1 }
 0x26b   : > { %v1948_v57 = vmax.f32 %v794_v52, 0.0  ;;  %v795_v58 = vadd.f32 %v1941_v48, %v676_v56 }
 0x26c   : > { %v1951_v59 = vmax.f32 %v797_v55, 0.0  ;;  %v828_v60 = vmul.f32 %v1945_v54, %v1945_v54 }
 0x26d   : > { %v1955_v61 = vmax.f32 %v795_v58, 0.0  ;;  %v826_v62 = vmul.f32 %v1948_v57, %v1948_v57 }
 0x26e   : > { %846 = vadd.xlane.f32.xlu1 %v828_v60  ;;  %v829_v2 = vmul.f32 %v1951_v59, %v1951_v59 }
 0x26f   : > { %842 = vadd.xlane.f32.xlu0 %v826_v62  ;;  %v1342_v63 = vpop.f32.mrb[4].mxu1  ;;  %v827_v5 = vmul.f32 %v1955_v61, %v1955_v61 }
 0x270   : > { %v800_v0 = vadd.f32 %v1342_v63, %v1941_v48  ;;  %v689_v1 = vpop.f32.mrb[5].mxu1 }
 0x271   : > { %v798_v3 = vadd.f32 %v1941_v48, %v689_v1  ;;  %v1343_v4 = vpop.f32.mrb[6].mxu1 }
 0x272   : > { %v1965_v6 = vmax.f32 %v800_v0, 0.0  ;;  %v801_v7 = vadd.f32 %v1343_v4, %v1941_v48  ;;  %848 = vadd.xlane.f32.xlu1 %v829_v2  ;;  %v692_v8 = vpop.f32.mrb[7].mxu1 }
 0x273   : > { %v799_v9 = vadd.f32 %v1941_v48, %v692_v8  ;;  %844 = vadd.xlane.f32.xlu0 %v827_v5  ;;  %v1973_v12 = vmax.f32 %v798_v3, 0.0 }
 0x274   : > { %v1969_v10 = vmax.f32 %v801_v7, 0.0  ;;  %v832_v11 = vmul.f32 %v1965_v6, %v1965_v6 }
 0x275   : > { %v1975_v13 = vmax.f32 %v799_v9, 0.0  ;;  %v830_v20 = vmul.f32 %v1973_v12, %v1973_v12 }
 0x276   : > { %v833_v14 = vmul.f32 %v1969_v10, %v1969_v10 }
 0x277   : > { %854 = vadd.xlane.f32.xlu0 %v832_v11  ;;  %v1346_v15 = vpop.f32.mrb[8].mxu1  ;;  %v831_v24 = vmul.f32 %v1975_v13, %v1975_v13 }
 0x278   : > { %v804_v16 = vadd.f32 %v1346_v15, %v1941_v48  ;;  %856 = vadd.xlane.f32.xlu1 %v833_v14  ;;  %v705_v17 = vpop.f32.mrb[9].mxu1 }
 0x279   : > { %v802_v18 = vadd.f32 %v1941_v48, %v705_v17  ;;  %v1347_v19 = vpop.f32.mrb[10].mxu1 }
 0x27a   : > { %v1983_v21 = vmax.f32 %v804_v16, 0.0  ;;  %v805_v22 = vadd.f32 %v1347_v19, %v1941_v48  ;;  %v708_v23 = vpop.f32.mrb[11].mxu1 }
 0x27b   : > { %v803_v25 = vadd.f32 %v1941_v48, %v708_v23  ;;  %850 = vadd.xlane.f32.xlu0 %v830_v20  ;;  %v1993_v28 = vmax.f32 %v802_v18, 0.0 }
 0x27c   : > { %v1989_v26 = vmax.f32 %v805_v22, 0.0  ;;  %852 = vadd.xlane.f32.xlu1 %v831_v24  ;;  %v836_v27 = vmul.f32 %v1983_v21, %v1983_v21 }
 0x27d   : > { %v1995_v29 = vmax.f32 %v803_v25, 0.0  ;;  %v834_v36 = vmul.f32 %v1993_v28, %v1993_v28 }
 0x27e   : > { %v837_v30 = vmul.f32 %v1989_v26, %v1989_v26 }
 0x27f   : > { %862 = vadd.xlane.f32.xlu0 %v836_v27  ;;  %v1350_v31 = vpop.f32.mrb[12].mxu1  ;;  %v835_v38 = vmul.f32 %v1995_v29, %v1995_v29 }
 0x280   : > { %864 = vadd.xlane.f32.xlu1 %v837_v30  ;;  %v721_v32 = vpop.f32.mrb[13].mxu1  ;;  %v808_v33 = vadd.f32 %v1350_v31, %v1941_v48 }
 0x281   : > { %v806_v34 = vadd.f32 %v1941_v48, %v721_v32  ;;  %v1351_v35 = vpop.f32.mrb[14].mxu1 }
 0x282   : > { %v724_v37 = vpop.f32.mrb[15].mxu1  ;;  %v809_v40 = vadd.f32 %v1351_v35, %v1941_v48  ;;  %v2009_v42 = vmax.f32 %v808_v33, 0.0 }
 0x283   : > { %v2005_v39 = vmax.f32 %v806_v34, 0.0  ;;  %v807_v41 = vadd.f32 %v1941_v48, %v724_v37  ;;  %858 = vadd.xlane.f32.xlu0 %v834_v36 }
 0x284   : > { %860 = vadd.xlane.f32.xlu1 %v835_v38  ;;  %v2015_v45 = vmax.f32 %v809_v40, 0.0  ;;  %v840_v47 = vmul.f32 %v2009_v42, %v2009_v42 }
 0x285   : > { %v2011_v43 = vmax.f32 %v807_v41, 0.0  ;;  %v838_v44 = vmul.f32 %v2005_v39, %v2005_v39 }
 0x286   : > { %v841_v48 = vmul.f32 %v2015_v45, %v2015_v45 }
 0x287   : > { %866 = vadd.xlane.f32.xlu0 %v838_v44  ;;  %v839_v46 = vmul.f32 %v2011_v43, %v2011_v43 }
 0x289   : > { %868 = vadd.xlane.f32.xlu1 %v839_v46 }
 0x28b   : > { %870 = vadd.xlane.f32.xlu0 %v840_v47 }
 0x28d   : > { %872 = vadd.xlane.f32.xlu1 %v841_v48 }
 0x2fb   : > { %v847_v49 = vpop.xlane.xlu1 %846 }
 0x2fc   : > { %v843_v50 = vpop.xlane.xlu0 %842  ;;  %1458 = vrsqrt.f32 %v847_v49 }
 0x2fd   : > { %1460 = vrsqrt.f32 %v843_v50 }
 0x2ff   : > { %v849_v51 = vpop.xlane.xlu1 %848 }
 0x300   : > { %1462 = vrsqrt.f32 %v849_v51  ;;  %v845_v52 = vpop.xlane.xlu0 %844 }
 0x301   : > { %1464 = vrsqrt.f32 %v845_v52 }
 0x304   : > { %v855_v53 = vpop.xlane.xlu0 %854 }
 0x305   : > { %1466 = vrsqrt.f32 %v855_v53  ;;  %v857_v55 = vpop.xlane.xlu1 %856 }
 0x306   : > { %1468 = vrsqrt.f32 %v857_v55  ;;  %v1459_v56 = vpop.eup %1458 }
 0x307   : > { %v1461_v60 = vpop.eup %1460  ;;  %v892_v1 = vmul.f32 %v1459_v56, %v1945_v54 }
 0x308   : > { %v851_v58 = vpop.xlane.xlu0 %850  ;;  %v890_v3 = vmul.f32 %v1461_v60, %v1948_v57 }
 0x309   : > { %1470 = vrsqrt.f32 %v851_v58  ;;  %v853_v62 = vpop.xlane.xlu1 %852 }
 0x30a   : > { %v1463_v63 = vpop.eup %1462  ;;  %1472 = vrsqrt.f32 %v853_v62 }
 0x30b   : > { %v1465_v0 = vpop.eup %1464  ;;  %v893_v2 = vmul.f32 %v1463_v63, %v1951_v59 }
 0x30c   : > { %v891_v4 = vmul.f32 %v1465_v0, %v1955_v61  ;;  %v863_v5 = vpop.xlane.xlu0 %862 }
 0x30d   : > { %v1217_v7 = vpack.c.bf16 %v893_v2, %v892_v1  ;;  %1474 = vrsqrt.f32 %v863_v5  ;;  %v865_v8 = vpop.xlane.xlu1 %864 }
 0x30e   : > { %v1212_v9 = vpack.c.bf16 %v891_v4, %v890_v3  ;;  %1476 = vrsqrt.f32 %v865_v8 }
 0x30f   : > { %v1467_v11 = vpop.eup %1466  ;;  %1249 = vst [vmem:[%s2028_s14 + $0x8] sm:$0xff] %v1217_v7  }
 0x310   : > { %v1469_v54 = vpop.eup %1468  ;;  %1213 = vst [vmem:[%s2028_s14] sm:$0xff] %v1212_v9   ;;  %v896_v59 = vmul.f32 %v1467_v11, %v1965_v6  ;;  %v859_v57 = vpop.xlane.xlu0 %858 }
 0x311   : > { %v897_v61 = vmul.f32 %v1469_v54, %v1969_v10  ;;  %1478 = vrsqrt.f32 %v859_v57  ;;  %v861_v14 = vpop.xlane.xlu1 %860 }
 0x312   : > { %1480 = vrsqrt.f32 %v861_v14 }
 0x313   : > { %v1471_v15 = vpop.eup %1470  ;;  %v1227_v16 = vpack.c.bf16 %v897_v61, %v896_v59 }
 0x314   : > { %v1473_v17 = vpop.eup %1472  ;;  %v894_v18 = vmul.f32 %v1471_v15, %v1973_v12  ;;  %v867_v19 = vpop.xlane.xlu0 %866 }
 0x315   : > { %1251 = vst [vmem:[%s2028_s14 + $0x18] sm:$0xff] %v1227_v16   ;;  %v895_v20 = vmul.f32 %v1473_v17, %v1975_v13  ;;  %1482 = vrsqrt.f32 %v867_v19 }
 0x316   : > { %v869_v22 = vpop.xlane.xlu1 %868 }
 0x317   : > { %v1475_v6 = vpop.eup %1474  ;;  %v1222_v23 = vpack.c.bf16 %v895_v20, %v894_v18  ;;  %1484 = vrsqrt.f32 %v869_v22 }
 0x318   : > { %v1477_v10 = vpop.eup %1476  ;;  %v900_v24 = vmul.f32 %v1475_v6, %v1983_v21  ;;  %v871_v25 = vpop.xlane.xlu0 %870 }
 0x319   : > { %1250 = vst [vmem:[%s2028_s14 + $0x10] sm:$0xff] %v1222_v23   ;;  %v901_v27 = vmul.f32 %v1477_v10, %v1989_v26  ;;  %1486 = vrsqrt.f32 %v871_v25 }
 0x31a   : > { %v873_v12 = vpop.xlane.xlu1 %872 }
 0x31b   : > { %v1479_v30 = vpop.eup %1478  ;;  %v1237_v13 = vpack.c.bf16 %v901_v27, %v900_v24  ;;  %1488 = vrsqrt.f32 %v873_v12 }
 0x31c   : > { %v1481_v31 = vpop.eup %1480  ;;  %v898_v32 = vmul.f32 %v1479_v30, %v1993_v28 }
 0x31d   : > { %1253 = vst [vmem:[%s2028_s14 + $0x28] sm:$0xff] %v1237_v13   ;;  %v899_v33 = vmul.f32 %v1481_v31, %v1995_v29 }
 0x31f   : > { %v1483_v21 = vpop.eup %1482  ;;  %v1232_v34 = vpack.c.bf16 %v899_v33, %v898_v32 }
 0x320   : > { %v902_v26 = vmul.f32 %v1483_v21, %v2005_v39 }
 0x321   : > { %v1485_v35 = vpop.eup %1484  ;;  %1252 = vst [vmem:[%s2028_s14 + $0x20] sm:$0xff] %v1232_v34  }
 0x322   : > { %v903_v36 = vmul.f32 %v1485_v35, %v2011_v43 }
 0x323   : > { %v1487_v37 = vpop.eup %1486 }
 0x324   : > { %v1242_v38 = vpack.c.bf16 %v903_v36, %v902_v26  ;;  %v904_v28 = vmul.f32 %v1487_v37, %v2009_v42 }
 0x325   : > { %v1489_v40 = vpop.eup %1488 }
 0x326   : > { %1254 = vst [vmem:[%s2028_s14 + $0x30] sm:$0xff] %v1242_v38   ;;  %v905_v29 = vmul.f32 %v1489_v40, %v2015_v45 }
 0x328   : > { %v1247_v39 = vpack.c.bf16 %v905_v29, %v904_v28 }
 0x32a   : > { %1255 = vst [vmem:[%s2028_s14 + $0x38] sm:$0xff] %v1247_v39  }
 0x32b   : > { %1591 = shalt.err (!%p1588_p8)
}
 0x32c   : > { %s1592_s8 = scalar_lea.hbm %s2054_s10, 1024  ;;  %s1596_s25 = scalar_lea.hbm %s2110_s4, 2048 }
 0x32d   : > { %p1593_p12 = scmp.ne.s32.totalorder %s2054_s10, %s1592_s8  ;;  %p1597_p6 = scmp.lt.u32.totalorder %s2054_s10, %s2110_s4 }
 0x32e   : > { %p1598_p13 = scmp.lt.u32.totalorder %s1596_s25, %s1592_s8  ;;  %p1600_p5 = scmp.lt.u32.totalorder %s1592_s8, %s2054_s10 }
 0x32f   : > { %p1594_p11 = pnand %p1593_p12, %p1798_p10 }
 0x330   : > { %p1599_p0 = por %p1598_p13, %p1597_p6 }
 0x331   : > { %p1595_p3 = pneg %p1594_p11 }
 0x332   : > { %p1601_p9 = por %p1600_p5, %p1599_p0 }
 0x334   : > { %p1602_p1 = pnand %p1601_p9, %p1595_p3 }
 0x336   : > { %1605 = shalt.err (!%p1602_p1)
}
 0x337   : > { %s1676_s21 = smov 64   ;;  %s1677_s23 = smov 4  }
 0x338   : > { %1360 = dma.vmem_to_hbm [thread:$0]  (%p1798_p10), %s2056_s26, 1024, %s2054_s10, %s987_s18, %s1676_s21, %s1676_s21, %s1677_s23  }
 0x339 PF: > { %s1017_s14 = sand.u32 1, %s1648_s15   ;;  %p2138_p2 = scmp.ne.s32.totalorder %s2122_s24, 0 }
 0x33a   : > { %p2139_p7 = scmp.ge.s32.totalorder %s1668_s20, 2  ;;  %s1018_s30 = scalar_lea.sflag [#allocation5], %s1017_s14 }
 0x33c   : > { %p1374_p4 = pnand %p2139_p7, %p2138_p2 }
 0x33e   : > { %1643 = dma.done.wait (!%p1374_p4), %s1018_s30, 1024  }
 0x33f   : > { %1645 = vsyncadd (!%p1374_p4), %s1018_s30, 4294966272  ;;  %s23_s20 = sadd.s32 1, %s1668_s20   ;;  %s2140_s28 = sld [smem:[#allocation14_spill]] }
 0x340   : > { %p20_p8 = scmp.ge.s32.totalorder %s23_s20, 4   ;;  %s2141_s15 = smov %s1652_s16 }
 0x341   : > { %s2142_s16 = smov %s1656_s17  ;;  %s2143_s17 = smov %s1807_s7 }
 0x342   : > { %s2144_s18 = smov %s1664_s19  ;;  %22 = sbr.rel (!%p20_p8) target bundleno = 11 (0xb), region = 106 }
 0x345   : > { %s2145_s19 = smov %s2140_s28 }
 0x349   :  { %1023 = vsyncpa [#allocation4], 1 }
 0x34a   :  { %1025 = vsyncpa [#allocation4 + $0x1], 1 }
 0x34b   :  { %1026 = vsyncpa [#allocation7], 1 }
 0x34c   :  { %1028 = vsyncpa [#allocation7 + $0x1], 1 }
 0x34d   :  { %1029 = vsyncpa [#allocation5], 1 }
 0x34e   :  { %1031 = vsyncpa [#allocation5 + $0x1], 1 }

</bundles_post_ra>
